<compile_context>
chip_gen: v6e
topology: v6e:2x2x1
jax: 0.10.0
libtpu: 0.0.40
codegen_flags: <defaults>
</compile_context>

<pallas_src>
import functools
import math

import jax
import jax.numpy as jnp
from jax.experimental import pallas as pl
from jax.experimental.pallas import tpu as pltpu


# ----------------------------- small helpers --------------------------------

def _cdiv(a, b):
    return -(-a // b)


def _round_up(a, m):
    return _cdiv(a, m) * m


def _sublanes(dtype):
    # Native second-minor tile for a dtype: 8 (4-byte), 16 (2-byte), 32 (1-byte).
    return {4: 8, 2: 16, 1: 32}.get(jnp.dtype(dtype).itemsize, 8)


def _vmem_limit_bytes():
    # Per-generation scoped-VMEM limit: 3/4 of physical, capped at 96 MiB
    # (v5e/v6e: 128 MiB physical -> 96 MiB; v7x: 64 MiB/TC -> 48 MiB).
    cap = None
    try:
        cap = getattr(pltpu.get_tpu_info(), "vmem_capacity_bytes", None)
    except Exception:
        cap = None
    if not cap:
        cap = 64 << 20          # conservative fallback (v7x per-TC physical)
    return int(max(min((int(cap) * 3) // 4, 96 << 20), 32 << 20))


def _choose_tile_b(batch, granule, bytes_per_row, budget, min_steps=2,
                   max_tile=1 << 16):
    """Largest granule-aligned batch tile fitting `budget`, with >= min_steps steps."""
    rows = max(granule, (budget // max(bytes_per_row, 1)) // granule * granule)
    rows = min(rows, max_tile)
    tile = min(rows, _round_up(batch, granule))
    if batch >= min_steps * granule:
        # Never collapse to a 1-step grid when the batch can be split: a single
        # step disables double-buffering and megacore sharding.
        tile = min(tile, _round_up(_cdiv(batch, min_steps), granule))
    return max(tile, granule)


# ------------------------------- kernels -------------------------------------

def _actor_kernel_packed(x_ref, w1_ref, b1_ref, w2_ref, b2t_ref, o_ref, *,
                         dim_state):
    # x_ref is the lane-dense (rows, 128) slab of this batch tile; unpack it to
    # (tile_b, dim_state).  This reshape is a relayout (XLU/VMEM traffic), but
    # the kernel is HBM-bound so it hides under the input DMA.
    x = x_ref[...].reshape(-1, dim_state)
    h = jnp.dot(x, w1_ref[...], preferred_element_type=jnp.float32)
    h = jnp.maximum(h + b1_ref[...].astype(jnp.float32), 0.0)
    y = jnp.dot(h.astype(w2_ref.dtype), w2_ref[...],
                preferred_element_type=jnp.float32)
    # Pack (tile_b, dim_act) -> (tile_b*dim_act//128, 128) BEFORE the epilogue:
    # bias + tanh then run only on valid lanes.  b2t is the (1,128)-tiled bias.
    y = y.reshape(o_ref.shape)
    y = jnp.tanh(y + b2t_ref[...].astype(jnp.float32))
    o_ref[...] = y.astype(o_ref.dtype)


def _actor_kernel_natural(x_ref, w1_ref, b1_ref, w2_ref, b2_ref, o_ref):
    # Natural-layout path (small or oddly-shaped batches): no packing tricks.
    h = jnp.dot(x_ref[...], w1_ref[...], preferred_element_type=jnp.float32)
    h = jnp.maximum(h + b1_ref[...].astype(jnp.float32), 0.0)
    y = jnp.dot(h.astype(w2_ref.dtype), w2_ref[...],
                preferred_element_type=jnp.float32)
    o_ref[...] = jnp.tanh(y + b2_ref[...].astype(jnp.float32)).astype(o_ref.dtype)


# ------------------------------- wrapper --------------------------------------

def dummy_actor_forward(x, w1, b1, w2, b2):
    """Forward pass of DummyActorModel.  x: (B, dim_state) -> (B, dim_act)."""
    B, dim_state = x.shape
    hidden = w1.shape[1]
    dim_act = w2.shape[1]
    out_dtype = x.dtype
    b1 = b1.reshape(1, hidden)
    b2 = b2.reshape(1, dim_act)

    in_isz = jnp.dtype(x.dtype).itemsize
    out_isz = jnp.dtype(out_dtype).itemsize
    s_in, s_out = _sublanes(x.dtype), _sublanes(out_dtype)

    vmem_limit = _vmem_limit_bytes()
    cparams = pltpu.CompilerParams(
        dimension_semantics=("parallel",),     # megacore sharding of the batch grid
        vmem_limit_bytes=vmem_limit,
    )
    # Batch-proportional VMEM budget: leave headroom for the resident
    # weights/bias (<1 MiB here) and compiler scratch.
    budget = max(vmem_limit - (8 << 20), 8 << 20)
    # The two matmuls keep up to ~3 concurrently-live f32 temporaries whose
    # minor dim is 128-lane padded (unpacked x / h / y) -- that, not the DMA
    # tiles, dominates the per-row footprint.
    lane_pad = 128 * _cdiv(max(dim_state, hidden, dim_act), 128)
    tmp_bytes = 3 * lane_pad * 4

    # ---------------- packed (lane-dense) path --------------------------------
    packed_ok = ((B * dim_state) % 128 == 0 and (B * dim_act) % 128 == 0
                 and 128 % dim_act == 0)
    if packed_ok:
        # Batch-tile granule so both packed block shapes are (sublane,128) tiled.
        g_in = (128 * s_in) // math.gcd(dim_state, 128 * s_in)
        g_out = (128 * s_out) // math.gcd(dim_act, 128 * s_out)
        granule = g_in * g_out // math.gcd(g_in, g_out)
        packed_ok = B >= granule
    if packed_ok:
        bytes_per_row = 2 * (dim_state * in_isz + dim_act * out_isz) + tmp_bytes
        tile_b = _choose_tile_b(B, granule, bytes_per_row, budget, min_steps=2)
        rows_in = (tile_b * dim_state) // 128
        rows_out = (tile_b * dim_act) // 128
        x_packed = x.reshape((B * dim_state) // 128, 128)    # free: contiguous view
        b2_tiled = jnp.tile(b2, (1, 128 // dim_act))          # bias in packed layout

        out_packed = pl.pallas_call(
            functools.partial(_actor_kernel_packed, dim_state=dim_state),
            out_shape=jax.ShapeDtypeStruct(((B * dim_act) // 128, 128), out_dtype),
            grid=(_cdiv(B, tile_b),),                         # ragged tail is masked
            in_specs=[
                pl.BlockSpec((rows_in, 128), lambda i: (i, 0)),      # lane-dense x
                pl.BlockSpec((dim_state, hidden), lambda i: (0, 0)),  # resident w1
                pl.BlockSpec((1, hidden), lambda i: (0, 0)),          # resident b1
                pl.BlockSpec((hidden, dim_act), lambda i: (0, 0)),    # resident w2
                pl.BlockSpec((1, 128), lambda i: (0, 0)),             # tiled b2
            ],
            out_specs=pl.BlockSpec((rows_out, 128), lambda i: (i, 0)),
            compiler_params=cparams,
        )(x_packed, w1, b1, w2, b2_tiled)
        return out_packed.reshape(B, dim_act)

    # ---------------- natural-layout fallback ----------------------------------
    bytes_per_row = (2 * (128 * _cdiv(dim_state, 128) * in_isz
                          + 128 * _cdiv(dim_act, 128) * out_isz) + tmp_bytes)
    max_rows = max(8, budget // bytes_per_row)
    if B <= max_rows:
        tile_b, grid = B, (1,)           # whole batch as one unpadded full block
    else:
        sub = s_in * s_out // math.gcd(s_in, s_out)
        tile_b = max(sub, (max_rows // sub) * sub)
        grid = (_cdiv(B, tile_b),)       # ragged last tile handled by Pallas masking

    return pl.pallas_call(
        _actor_kernel_natural,
        out_shape=jax.ShapeDtypeStruct((B, dim_act), out_dtype),
        grid=grid,
        in_specs=[
            pl.BlockSpec((tile_b, dim_state), lambda i: (i, 0)),
            pl.BlockSpec((dim_state, hidden), lambda i: (0, 0)),
            pl.BlockSpec((1, hidden), lambda i: (0, 0)),
            pl.BlockSpec((hidden, dim_act), lambda i: (0, 0)),
            pl.BlockSpec((1, dim_act), lambda i: (0, 0)),
        ],
        out_specs=pl.BlockSpec((tile_b, dim_act), lambda i: (i, 0)),
        compiler_params=cparams,
    )(x, w1, b1, w2, b2)


# ------------------------------- params / demo --------------------------------

def init_params(key, dim_state, dim_act, hidden=64):
    # Deterministic init mimicking PyTorch nn.Linear default (+/- 1/sqrt(fan_in)).
    # Weights are stored pre-transposed as (in_features, out_features).
    k1, k2, k3, k4 = jax.random.split(key, 4)
    lim1 = 1.0 / math.sqrt(dim_state)
    lim2 = 1.0 / math.sqrt(hidden)
    w1 = jax.random.uniform(k1, (dim_state, hidden), jnp.float32, -lim1, lim1)
    b1 = jax.random.uniform(k2, (1, hidden), jnp.float32, -lim1, lim1)
    w2 = jax.random.uniform(k3, (hidden, dim_act), jnp.float32, -lim2, lim2)
    b2 = jax.random.uniform(k4, (1, dim_act), jnp.float32, -lim2, lim2)
    return w1, b1, w2, b2


def _reference(x, w1, b1, w2, b2):
    h = jnp.maximum(jnp.dot(x, w1, precision=jax.lax.Precision.HIGHEST) + b1, 0.0)
    return jnp.tanh(jnp.dot(h, w2, precision=jax.lax.Precision.HIGHEST) + b2)


if __name__ == "__main__":
    dim_state, dim_act = 16, 4
    key = jax.random.PRNGKey(0)
    kx_small, kx_big, kp = jax.random.split(key, 3)
    w1, b1, w2, b2 = init_params(kp, dim_state, dim_act)

    # 1) Tiny batch: natural single-block path (no padding for small B).
    x_small = jax.random.normal(kx_small, (8, dim_state), dtype=jnp.float32)
    out_small = dummy_actor_forward(x_small, w1, b1, w2, b2)
    jax.block_until_ready(out_small)
    assert out_small.shape == (8, dim_act)
    assert jnp.allclose(out_small, _reference(x_small, w1, b1, w2, b2), atol=2e-3), \
        "small-batch f32 mismatch vs reference"

    # 2) Larger batch: packed lane-dense path, >=2 grid steps (megacore/pipelining).
    B = 4096
    x_big = jax.random.normal(kx_big, (B, dim_state), dtype=jnp.float32)
    out_big = dummy_actor_forward(x_big, w1, b1, w2, b2)
    jax.block_until_ready(out_big)
    ref_big = _reference(x_big, w1, b1, w2, b2)
    assert out_big.shape == (B, dim_act)
    assert jnp.allclose(out_big, ref_big, atol=2e-3), "f32 mismatch vs reference"

    # 3) bf16 inputs/weights on the packed path (f32 accumulation + f32 epilogue).
    out_bf16 = dummy_actor_forward(
        x_big.astype(jnp.bfloat16),
        w1.astype(jnp.bfloat16), b1,
        w2.astype(jnp.bfloat16), b2,
    )
    jax.block_until_ready(out_bf16)
    assert out_bf16.shape == (B, dim_act)
    assert jnp.allclose(out_bf16.astype(jnp.float32), ref_big, atol=1e-1), \
        "bf16 mismatch vs reference"

    print("KERNEL_OK")
</pallas_src>

<mosaic_0001>
module attributes {stable_mosaic.version = 11 : i64} {
  func.func @_actor_kernel_natural(%arg0: i32, %arg1: memref<8x16xf32, #tpu.memory_space<vmem>>, %arg2: memref<16x64xf32, #tpu.memory_space<vmem>>, %arg3: memref<1x64xf32, #tpu.memory_space<vmem>>, %arg4: memref<64x4xf32, #tpu.memory_space<vmem>>, %arg5: memref<1x4xf32, #tpu.memory_space<vmem>>, %arg6: memref<8x4xf32, #tpu.memory_space<vmem>>) attributes {dimension_semantics = [#tpu.dimension_semantics<parallel>], iteration_bounds = array<i64: 1>, scalar_prefetch = 0 : i64, scratch_operands = 0 : i64, tpu.core_type = #tpu.core_type<tc>, window_params = [{transform_indices = @transform_0, window_bounds = array<i64: 8, 16>}, {pipeline_mode = #tpu.pipeline_mode<synchronous>, transform_indices = @transform_1, window_bounds = array<i64: 16, 64>}, {pipeline_mode = #tpu.pipeline_mode<synchronous>, transform_indices = @transform_2, window_bounds = array<i64: 1, 64>}, {pipeline_mode = #tpu.pipeline_mode<synchronous>, transform_indices = @transform_3, window_bounds = array<i64: 64, 4>}, {pipeline_mode = #tpu.pipeline_mode<synchronous>, transform_indices = @transform_4, window_bounds = array<i64: 1, 4>}, {transform_indices = @transform_5, window_bounds = array<i64: 8, 4>}]} {
    %c0 = arith.constant 0 : index
    %c0_0 = arith.constant 0 : index
    %0 = vector.load %arg1[%c0, %c0_0] : memref<8x16xf32, #tpu.memory_space<vmem>>, vector<8x16xf32>
    %c0_1 = arith.constant 0 : index
    %c0_2 = arith.constant 0 : index
    %1 = vector.load %arg2[%c0_1, %c0_2] : memref<16x64xf32, #tpu.memory_space<vmem>>, vector<16x64xf32>
    %cst = arith.constant dense<0.000000e+00> : vector<8x64xf32>
    %2 = tpu.matmul %0, %1, %cst {dimension_numbers = #tpu.dot_dimension_numbers<[1], [0], [0], [1], [0, 0, 1, 1], [], []>} : vector<8x16xf32>, vector<16x64xf32>, vector<8x64xf32> -> vector<8x64xf32>
    %c0_3 = arith.constant 0 : index
    %c0_4 = arith.constant 0 : index
    %3 = vector.load %arg3[%c0_3, %c0_4] : memref<1x64xf32, #tpu.memory_space<vmem>>, vector<1x64xf32>
    %4 = vector.broadcast %3 : vector<1x64xf32> to vector<8x64xf32>
    %5 = arith.addf %2, %4 : vector<8x64xf32>
    %cst_5 = arith.constant 0.000000e+00 : f32
    %6 = vector.broadcast %cst_5 : f32 to vector<8x64xf32>
    %7 = arith.maximumf %5, %6 : vector<8x64xf32>
    %c0_6 = arith.constant 0 : index
    %c0_7 = arith.constant 0 : index
    %8 = vector.load %arg4[%c0_6, %c0_7] : memref<64x4xf32, #tpu.memory_space<vmem>>, vector<64x4xf32>
    %cst_8 = arith.constant dense<0.000000e+00> : vector<8x4xf32>
    %9 = tpu.matmul %7, %8, %cst_8 {dimension_numbers = #tpu.dot_dimension_numbers<[1], [0], [0], [1], [0, 0, 1, 1], [], []>} : vector<8x64xf32>, vector<64x4xf32>, vector<8x4xf32> -> vector<8x4xf32>
    %c0_9 = arith.constant 0 : index
    %c0_10 = arith.constant 0 : index
    %10 = vector.load %arg5[%c0_9, %c0_10] : memref<1x4xf32, #tpu.memory_space<vmem>>, vector<1x4xf32>
    %11 = vector.broadcast %10 : vector<1x4xf32> to vector<8x4xf32>
    %12 = arith.addf %9, %11 : vector<8x4xf32>
    %13 = math.tanh %12 : vector<8x4xf32>
    %c0_11 = arith.constant 0 : index
    %c0_12 = arith.constant 0 : index
    %14 = vector.load %arg6[%c0_11, %c0_12] : memref<8x4xf32, #tpu.memory_space<vmem>>, vector<8x4xf32>
    tpu.vector_store %arg6[%c0_11, %c0_12], %13 {strides = array<i32>} : memref<8x4xf32, #tpu.memory_space<vmem>>, vector<8x4xf32>,
    return
  }
  func.func @transform_0(%arg0: i32) -> (i32, i32) {
    %c0_i32 = arith.constant 0 : i32
    %c0_i32_0 = arith.constant 0 : i32
    return %arg0, %c0_i32 : i32, i32
  }
  func.func @transform_1(%arg0: i32) -> (i32, i32) {
    %c0_i32 = arith.constant 0 : i32
    %c0_i32_0 = arith.constant 0 : i32
    %c0_i32_1 = arith.constant 0 : i32
    return %c0_i32, %c0_i32_0 : i32, i32
  }
  func.func @transform_2(%arg0: i32) -> (i32, i32) {
    %c0_i32 = arith.constant 0 : i32
    %c0_i32_0 = arith.constant 0 : i32
    %c0_i32_1 = arith.constant 0 : i32
    return %c0_i32, %c0_i32_0 : i32, i32
  }
  func.func @transform_3(%arg0: i32) -> (i32, i32) {
    %c0_i32 = arith.constant 0 : i32
    %c0_i32_0 = arith.constant 0 : i32
    %c0_i32_1 = arith.constant 0 : i32
    return %c0_i32, %c0_i32_0 : i32, i32
  }
  func.func @transform_4(%arg0: i32) -> (i32, i32) {
    %c0_i32 = arith.constant 0 : i32
    %c0_i32_0 = arith.constant 0 : i32
    %c0_i32_1 = arith.constant 0 : i32
    return %c0_i32, %c0_i32_0 : i32, i32
  }
  func.func @transform_5(%arg0: i32) -> (i32, i32) {
    %c0_i32 = arith.constant 0 : i32
    %c0_i32_0 = arith.constant 0 : i32
    return %arg0, %c0_i32 : i32, i32
  }
}

</mosaic_0001>

<bundles_post_ra>
// kernel: tpu_custom_call.1
= control target key start
LH: loop header
LB: loop body
LE: loop exit
PB: predicated region body
PF: predicated region fallthrough
CT: control target
= control target key end

     0   :  { %v247_v0 = vmov 0.0   ;;  %vm248_vm0 = vmmov 0   ;;  %vm30_vm1 = vcmask 130048   ;;  %vm120_vm2 = vcmask 523264   ;;  %s323_s1 = inlined_call_operand.vmem [shape: f32[16,64], index: 1, kind: input, shape index: {}]   ;;  %s324_s0 = inlined_call_operand.vmem [shape: f32[8,16], index: 0, kind: input, shape index: {}]   ;;  %s325_s3 = inlined_call_operand.vmem [shape: f32[64,4], index: 3, kind: input, shape index: {}]   ;;  %s326_s2 = inlined_call_operand.vmem [shape: f32[1,64], index: 2, kind: input, shape index: {}]   ;;  %s327_s4 = inlined_call_operand.vmem [shape: f32[1,4], index: 4, kind: input, shape index: {}]   ;;  %s328_s5 = inlined_call_operand.vmem [shape: f32[8,4], index: 5, kind: output, shape index: {}]  }
   0x1   :  { %217 = vmatprep.subr.mxu0 %v247_v0  ;;  %v22_v1 = vld [vmem:[%s323_s1 + $0x8] sm:$0xff]  ;;  %v21_v2 = vld [vmem:[%s323_s1] sm:$0xff]  ;;  %221 = vmatprep.mubr.msk.f32.mxu0 %vm248_vm0, %v247_v0  ;;  %v112_v4 = vld [vmem:[%s325_s3 + $0x38] sm:$0xff]  ;;  %vm195_vm3 = vcmask 31744  }
   0x2   :  { %218 = vmatpush3.msra.mxu0 %v22_v1  ;;  %v20_v3 = vld [vmem:[%s324_s0] sm:$0xff]  ;;  %224 = vmatprep.subr.mxu1 %v247_v0  ;;  %v111_v5 = vld [vmem:[%s325_s3 + $0x30] sm:$0xff]  ;;  %v110_v6 = vld [vmem:[%s325_s3 + $0x28] sm:$0xff] }
   0x3   :  { %219 = vmatprep.subr.mxu0 %v247_v0  ;;  %225 = vmatpush3.msra.mxu1 %v112_v4  ;;  %v109_v7 = vld [vmem:[%s325_s3 + $0x20] sm:$0xff]  ;;  %v108_v8 = vld [vmem:[%s325_s3 + $0x18] sm:$0xff]  ;;  %v107_v9 = vld [vmem:[%s325_s3 + $0x10] sm:$0xff] }
   0x4   :  { %220 = vmatpush3.msra.mxu0 %v21_v2  ;;  %226 = vmatprep.subr.mxu1 %v247_v0  ;;  %v106_v10 = vld [vmem:[%s325_s3 + $0x8] sm:$0xff]  ;;  %v105_v11 = vld [vmem:[%s325_s3] sm:$0xff] }
   0x5   :  { %222 = vmatmul.mubr.msk.f32.vlgmr.msra.gmra.mxu0 %vm30_vm1, %v20_v3  ;;  %227 = vmatpush3.msra.mxu1 %v111_v5  ;;  %v201_v12 = vld [vmem:[%s326_s2] ss:$0 sm:$0xff] }
   0x6   :  { %228 = vmatprep.subr.mxu1 %v247_v0  ;;  %240 = vmatprep.mubr.msk.f32.mxu1 %vm248_vm0, %v247_v0  ;;  %v203_v17 = vld [vmem:[%s327_s4] ss:$0 sm:$0xff] }
   0x7   :  { %229 = vmatpush3.msra.mxu1 %v110_v6 }
   0x8   :  { %230 = vmatprep.subr.mxu1 %v247_v0 }
   0x9   :  { %231 = vmatpush3.msra.mxu1 %v109_v7 }
   0xa   :  { %232 = vmatprep.subr.mxu1 %v247_v0 }
   0xb   :  { %233 = vmatpush3.msra.mxu1 %v108_v8 }
   0xc   :  { %234 = vmatprep.subr.mxu1 %v247_v0 }
   0xd   :  { %235 = vmatpush3.msra.mxu1 %v107_v9 }
   0xe   :  { %236 = vmatprep.subr.mxu1 %v247_v0 }
   0xf   :  { %237 = vmatpush3.msra.mxu1 %v106_v10 }
  0x10   :  { %238 = vmatprep.subr.mxu1 %v247_v0 }
  0x11   :  { %239 = vmatpush3.msra.mxu1 %v105_v11 }
  0xc5   :  { %v100_v13 = vpop.f32.mrf.mxu0 }
  0xc6   :  { %v101_v14 = vadd.f32 %v201_v12, %v100_v13 }
  0xc7   :  { %v223_v15 = vpop.f32.mrf.mxu0 }
  0xc8   :  { %v104_v16 = vmax.f32 %v101_v14, 0.0 }
  0xca   :  { %241 = vmatmul.mubr.msk.f32.vlgmr.msra.gmra.mxu1 %vm120_vm2, %v104_v16 }
 0x18a   :  { %v190_v18 = vpop.f32.mrf.mxu1 }
 0x18b   :  { %v191_v19 = vadd.f32 %v203_v17, %v190_v18 }
 0x18c   :  { %v242_v20 = vpop.f32.mrf.mxu1 }
 0x18d   :  { %245 = vtanh.f32 %v191_v19 }
 0x19a   :  { %v246_v21 = vpop.eup %245 }
 0x19b   :  { %196 = vst.msk [vmem:[%s328_s5] sm:$0xff] %vm195_vm3, %v246_v21 }

</bundles_post_ra>
